<compile_context>
chip_gen: v7x
topology: tpu7x:2x2x1
jax: 0.10.0
libtpu: 0.0.40
codegen_flags: <defaults>
</compile_context>

<pallas_src>
import jax
import jax.numpy as jnp
from jax.experimental import pallas as pl
from jax.experimental.pallas import tpu as pltpu


def _ifnode5_kernel(w_ref, thr_ref, x_ref, o_ref):
    # w_ref: (T, T), thr_ref: (T, 1) f32, x_ref: (T, tm) native, o_ref: (T, tm)
    x = x_ref[...]
    if x.dtype != w_ref.dtype:            # only for non-float / exotic input dtypes
        x = x.astype(w_ref.dtype)
    h = jnp.dot(w_ref[...], x, preferred_element_type=jnp.float32)
    # heaviside(h + b) == (h >= -b) == (h >= thr); bias folded into the threshold.
    o_ref[...] = (h >= thr_ref[...]).astype(o_ref.dtype)


def _round_up(v, m):
    return (v + m - 1) // m * m


def _padded_rows(rows, itemsize):
    # VMEM sublane tiling: 8 rows (f32), 16 (bf16/fp16), 32 (int8/fp8).
    sub = 8 * max(1, 4 // itemsize)
    return _round_up(rows, sub)


def _vmem_capacity_bytes():
    try:
        cap = getattr(pltpu.get_tpu_info(), "vmem_capacity_bytes", None)
        if cap:
            return int(cap)
    except Exception:
        pass
    try:
        kind = jax.devices()[0].device_kind.lower()
        if "v5" in kind or "v6" in kind:
            return 128 << 20
    except Exception:
        pass
    return 64 << 20          # conservative (v7x per-TC VMEM)


def _pick_tile(T, M, in_bytes, out_bytes, *, tile_cap_bytes, payload_target, min_steps):
    Mp = _round_up(M, 128)
    lane = 512 if Mp >= 512 * min_steps else 128
    # Double-buffered in + out bytes per lane-column, sublane-packing aware.
    col_bytes = 2 * (_padded_rows(T, in_bytes) * in_bytes
                     + _padded_rows(T, out_bytes) * out_bytes)
    # Target payload per grid step (amortize ~0.35us/step fixed cost).
    tm = max(lane, (payload_target // max(1, T * in_bytes)) // lane * lane)
    # VMEM guard.
    cap = max(lane, (tile_cap_bytes // col_bytes) // lane * lane)
    tm = min(tm, cap)
    # Keep >= min_steps grid steps when there is enough data (pipelining; feeds
    # both v7x TensorCores via the "parallel" grid axis).
    if Mp >= min_steps * lane:
        tm = min(tm, max(lane, _round_up(pl.cdiv(Mp, min_steps), lane)))
    return min(tm, Mp)


def ifnode5_forward(x_seq, weight, bias, out_dtype=None):
    """x_seq: [T, ...]; weight: [T, T]; bias: [T].  Returns spikes shaped like x_seq.

    out_dtype defaults to x_seq.dtype (matches PyTorch).  Passing bf16/int8 here cuts
    HBM write traffic ~25-37% for f32 inputs (interface change, so opt-in only).
    """
    T = x_seq.shape[0]
    orig_shape = x_seq.shape
    if out_dtype is None:
        out_dtype = x_seq.dtype

    x = x_seq.reshape(T, -1)              # native dtype, no cast, no pad
    M = x.shape[1]

    in_bytes = x.dtype.itemsize
    out_bytes = jnp.dtype(out_dtype).itemsize

    # Generation-gated VMEM budget / tile sizing.
    if _vmem_capacity_bytes() >= (100 << 20):        # v5e / v6e: 128 MiB physical VMEM
        vmem_limit, tile_cap, payload = 64 << 20, 40 << 20, 8 << 20
    else:                                            # v7x: 64 MiB per-TC (keep guard)
        vmem_limit, tile_cap, payload = 32 << 20, 20 << 20, 2 << 20
    min_steps = 4

    tm = _pick_tile(T, M, in_bytes, out_bytes,
                    tile_cap_bytes=tile_cap, payload_target=payload, min_steps=min_steps)
    grid = (pl.cdiv(M, tm),)              # ragged last block handled by Pallas masking

    # Native low-precision MXU matmul for bf16/fp16 x; f32 weights otherwise.
    if jnp.issubdtype(x.dtype, jnp.floating) and in_bytes <= 2:
        w = weight.astype(x.dtype)
    else:
        w = weight.astype(jnp.float32)
    thr = (-bias.astype(jnp.float32)).reshape(T, 1)   # bias folded into threshold

    cost = pl.CostEstimate(
        flops=2 * T * T * M,
        transcendentals=0,
        bytes_accessed=T * M * (in_bytes + out_bytes) + T * T * w.dtype.itemsize + T * 4,
    )

    out = pl.pallas_call(
        _ifnode5_kernel,
        out_shape=jax.ShapeDtypeStruct((T, M), out_dtype),
        grid_spec=pltpu.PrefetchScalarGridSpec(
            num_scalar_prefetch=0,
            grid=grid,
            in_specs=[
                pl.BlockSpec((T, T), lambda i: (0, 0)),    # weight, resident in VMEM
                pl.BlockSpec((T, 1), lambda i: (0, 0)),    # threshold column, resident
                pl.BlockSpec((T, tm), lambda i: (0, i)),   # x tile along flattened dim
            ],
            out_specs=pl.BlockSpec((T, tm), lambda i: (0, i)),
        ),
        compiler_params=pltpu.CompilerParams(
            dimension_semantics=("parallel",),
            vmem_limit_bytes=vmem_limit,
        ),
        cost_estimate=cost,
    )(w, thr, x)

    return out.reshape(orig_shape)


if __name__ == "__main__":
    key = jax.random.PRNGKey(0)
    T = 8

    # nn.Linear(T, T): weight ~ U(-1/sqrt(T), 1/sqrt(T)); bias constant-initialized to -1.
    k_w, k_x1, k_x2 = jax.random.split(key, 3)
    bound = 1.0 / jnp.sqrt(jnp.float32(T))
    weight = jax.random.uniform(k_w, (T, T), minval=-bound, maxval=bound, dtype=jnp.float32)
    bias = jnp.full((T,), -1.0, dtype=jnp.float32)

    def check(x_seq, eps):
        spikes = jax.block_until_ready(ifnode5_forward(x_seq, weight, bias))
        h_ref = (weight @ x_seq.reshape(T, -1).astype(jnp.float32)) + bias[:, None]
        ref = (h_ref >= 0.0).astype(spikes.dtype).reshape(x_seq.shape)
        near_thr = (jnp.abs(h_ref) < eps).reshape(x_seq.shape)  # tolerate flips at threshold
        assert spikes.shape == x_seq.shape and spikes.dtype == x_seq.dtype
        assert bool(jnp.all(jnp.logical_or(spikes == ref, near_thr)))

    # 128-aligned flattened dim: M = 2*4*16*16 = 2048.
    x_aligned = jax.random.normal(k_x1, (T, 2, 4, 16, 16), dtype=jnp.float32)
    check(x_aligned, 1e-4)

    # Ragged flattened dim (exercises masked partial last block): M = 2*3*10*10 = 600.
    x_ragged = jax.random.normal(k_x2, (T, 2, 3, 10, 10), dtype=jnp.float32)
    check(x_ragged, 1e-4)

    # bf16 input: native bf16 MXU path + sublane-packed VMEM sizing.
    check(x_aligned.astype(jnp.bfloat16), 0.1)

    print("KERNEL_OK")
</pallas_src>

<mosaic_0001>
module attributes {stable_mosaic.version = 11 : i64} {
  func.func @_ifnode5_kernel(%arg0: i32, %arg1: memref<8x8xf32, #tpu.memory_space<vmem>>, %arg2: memref<8x1xf32, #tpu.memory_space<vmem>>, %arg3: memref<8x512xf32, #tpu.memory_space<vmem>>, %arg4: memref<8x512xf32, #tpu.memory_space<vmem>>) attributes {dimension_semantics = [#tpu.dimension_semantics<parallel>], iteration_bounds = array<i64: 4>, scalar_prefetch = 0 : i64, scratch_operands = 0 : i64, tpu.core_type = #tpu.core_type<tc>, window_params = [{pipeline_mode = #tpu.pipeline_mode<synchronous>, transform_indices = @transform_0, window_bounds = array<i64: 8, 8>}, {pipeline_mode = #tpu.pipeline_mode<synchronous>, transform_indices = @transform_1, window_bounds = array<i64: 8, 1>}, {transform_indices = @transform_2, window_bounds = array<i64: 8, 512>}, {transform_indices = @transform_3, window_bounds = array<i64: 8, 512>}]} {
    %c0 = arith.constant 0 : index
    %c0_0 = arith.constant 0 : index
    %0 = vector.load %arg3[%c0, %c0_0] : memref<8x512xf32, #tpu.memory_space<vmem>>, vector<8x512xf32>
    %c0_1 = arith.constant 0 : index
    %c0_2 = arith.constant 0 : index
    %1 = vector.load %arg1[%c0_1, %c0_2] : memref<8x8xf32, #tpu.memory_space<vmem>>, vector<8x8xf32>
    %cst = arith.constant dense<0.000000e+00> : vector<8x512xf32>
    %2 = tpu.matmul %1, %0, %cst {dimension_numbers = #tpu.dot_dimension_numbers<[1], [0], [0], [1], [0, 0, 1, 1], [], []>} : vector<8x8xf32>, vector<8x512xf32>, vector<8x512xf32> -> vector<8x512xf32>
    %c0_3 = arith.constant 0 : index
    %c0_4 = arith.constant 0 : index
    %3 = vector.load %arg2[%c0_3, %c0_4] : memref<8x1xf32, #tpu.memory_space<vmem>>, vector<8x1xf32>
    %4 = vector.broadcast %3 : vector<8x1xf32> to vector<8x512xf32>
    %5 = arith.cmpf oge, %2, %4 : vector<8x512xf32>
    %6 = arith.extui %5 : vector<8x512xi1> to vector<8x512xi32>
    %7 = arith.sitofp %6 : vector<8x512xi32> to vector<8x512xf32>
    %c0_5 = arith.constant 0 : index
    %c0_6 = arith.constant 0 : index
    %8 = vector.load %arg4[%c0_5, %c0_6] : memref<8x512xf32, #tpu.memory_space<vmem>>, vector<8x512xf32>
    tpu.vector_store %arg4[%c0_5, %c0_6], %7 {strides = array<i32>} : memref<8x512xf32, #tpu.memory_space<vmem>>, vector<8x512xf32>,
    return
  }
  func.func @transform_0(%arg0: i32) -> (i32, i32) {
    %c0_i32 = arith.constant 0 : i32
    %c0_i32_0 = arith.constant 0 : i32
    %c0_i32_1 = arith.constant 0 : i32
    return %c0_i32, %c0_i32_0 : i32, i32
  }
  func.func @transform_1(%arg0: i32) -> (i32, i32) {
    %c0_i32 = arith.constant 0 : i32
    %c0_i32_0 = arith.constant 0 : i32
    %c0_i32_1 = arith.constant 0 : i32
    return %c0_i32, %c0_i32_0 : i32, i32
  }
  func.func @transform_2(%arg0: i32) -> (i32, i32) {
    %c0_i32 = arith.constant 0 : i32
    %c0_i32_0 = arith.constant 0 : i32
    return %c0_i32, %arg0 : i32, i32
  }
  func.func @transform_3(%arg0: i32) -> (i32, i32) {
    %c0_i32 = arith.constant 0 : i32
    %c0_i32_0 = arith.constant 0 : i32
    return %c0_i32, %arg0 : i32, i32
  }
}

</mosaic_0001>

<bundles_post_ra>
// kernel: tpu_custom_call.1
= control target key start
LH: loop header
LB: loop body
LE: loop exit
PB: predicated region body
PF: predicated region fallthrough
CT: control target
= control target key end

     0   :  { %8 = vsyncpa [#allocation3], 0  ;;  %s805_s0 = inlined_call_operand.vmem [shape: f32[8,8], index: 0, kind: input, shape index: {}]   ;;  %s806_s1 = inlined_call_operand.vmem [shape: f32[8,1], index: 1, kind: input, shape index: {}]   ;;  %s807_s2 = inlined_call_operand.hbm [shape: f32[8,2048], index: 2, kind: input, shape index: {}]   ;;  %s808_s3 = inlined_call_operand.hbm [shape: f32[8,2048], index: 3, kind: output, shape index: {}]  }
   0x1   :  { %10 = vsyncpa [#allocation3 + $0x1], 0 }
   0x2   :  { %11 = vsyncpa [#allocation4], 0 }
   0x3   :  { %13 = vsyncpa [#allocation4 + $0x1], 0  ;;  %s640_s12 = smov 0   ;;  %s642_s13 = smov 0  }
   0x4   :  { %s644_s14 = smov 0   ;;  %s646_s15 = smov 0  }
   0x5 LB: > { %s661_s16 = sadd.s32 4294967295, %s614_s15   ;;  %s447_s17 = sadd.s32 4294967294, %s614_s15   ;;  %s614_s15 = sphi %s646_s15, %s822_s15   ;;  %s610_s14 = sphi %s644_s14, %s821_s14   ;;  %s606_s13 = sphi %s642_s13, %s820_s13   ;;  %s602_s12 = sphi %s640_s12, %s819_s12  }
   0x6   : > { %s665_s18 = sadd.s32 1, %s614_s15   ;;  %s68_s19 = sadd.s32 1, %s610_s14 }
   0x7   : > { %s65_s20 = ssub.s32 %s614_s15, %s665_s18  ;;  %p75_p0 = scmp.ne.s32.totalorder %s610_s14, %s606_s13 }
   0x8   : > { %p66_p1 = scmp.eq.s32.totalorder %s65_s20, 0  ;;  %p76_p2 = scmp.eq.s32.totalorder %s614_s15, 0 }
   0x9   : > { %p81_p3 = scmp.ne.s32.totalorder %s606_s13, %s602_s12  ;;  %p82_p4 = scmp.eq.s32.totalorder %s661_s16, 0 }
   0xa   : > { %s677_s21 = scalar_select %p66_p1, %s610_s14, %s68_s19  }
   0xb   : > { %p679_p5 = por %p76_p2, %p75_p0  ;;  %p683_p6 = por %p82_p4, %p81_p3 }
   0xc   : > { %p105_p7 = scmp.eq.s32.totalorder %s661_s16, 3  ;;  %p111_p8 = scmp.eq.s32.totalorder %s447_s17, 3 }
   0xd   : > { %p481_p9 = scmp.lt.s32.totalorder %s614_s15, 4  ;;  %s137_s26 = sand.u32 1, %s610_s14  }
   0xe   : > { %p689_p10 = por %p105_p7, %p75_p0  ;;  %p693_p11 = por %p111_p8, %p81_p3 }
   0xf   : > { %s467_s27 = sshll.u32 %s614_s15, 9  ;;  %s450_s28 = sshll.u32 %s137_s26, 5 }
  0x10   : > { %s812_s24 = scalar_select %p689_p10, 1, 0 }
  0x11   : > { %s813_s25 = scalar_select %p693_p11, 1, 0 }
  0x12   : > { %s702_s4 = scalar_lea.hbm %s807_s2, %s467_s27  ;;  %s141_s5 = scalar_lea.vmem [#allocation2], %s450_s28 }
  0x13   : > { %s149_s6 = sshll.u32 %s141_s5, 4  ;;  %p706_p12 = pnand %p481_p9, %p679_p5  ;;  %s710_s6 = int_to_ptr.vmem [resolvable:$true] %s149_s6 }
  0x14   : > { %s138_s8 = scalar_lea.sflag [#allocation3], %s137_s26  ;;  %s518_s9 = scalar_lea.hbm %s702_s4, 512 }
  0x15   : > { %p519_p1 = scmp.ne.s32.totalorder %s702_s4, %s518_s9  ;;  %p520_p2 = pneg %p706_p12 }
  0x16   : > { %s523_s17 = scalar_lea.hbm %s807_s2, 2048  ;;  %p524_p5 = scmp.lt.u32.totalorder %s702_s4, %s807_s2 }
  0x17   : > { %p521_p3 = pnand %p520_p2, %p519_p1  ;;  %p525_p7 = scmp.lt.u32.totalorder %s523_s17, %s518_s9 }
  0x18   : > { %p527_p9 = scmp.lt.u32.totalorder %s518_s9, %s702_s4 }
  0x19   : > { %p522_p4 = pneg %p521_p3  ;;  %p526_p8 = por %p525_p7, %p524_p5 }
  0x1b   : > { %p528_p13 = por %p527_p9, %p526_p8 }
  0x1d   : > { %p529_p0 = pnand %p528_p13, %p522_p4 }
  0x1f   : > { %532 = shalt.err (!%p529_p0)
}
  0x20   : > { %s533_s22 = scalar_lea.vmem %s710_s6, 512  ;;  %s616_s26 = smov [#allocation2]  }
  0x21   : > { %p534_p1 = scmp.ne.s32.totalorder %s710_s6, %s533_s22  ;;  %s538_s27 = sshll.u32 %s616_s26, 4  ;;  %s539_s27 = int_to_ptr.vmem [resolvable:$false] %s538_s27 }
  0x22   : > { %s540_s28 = scalar_lea.vmem %s539_s27, 1024  ;;  %p541_p10 = scmp.lt.s32.totalorder %s710_s6, %s539_s27 }
  0x23   : > { %p536_p3 = pnand %p534_p1, %p520_p2  ;;  %p542_p5 = scmp.lt.s32.totalorder %s540_s28, %s533_s22 }
  0x25   : > { %p537_p11 = pneg %p536_p3  ;;  %p543_p7 = por %p542_p5, %p541_p10 }
  0x27   : > { %p544_p8 = pnand %p543_p7, %p537_p11 }
  0x29   : > { %547 = shalt.err (!%p544_p8)
}
  0x2a   : > { %476 = dma.hbm_to_vmem [thread:$0]  (!%p706_p12), %s702_s4, 512, %s710_s6, %s138_s8  }
  0x2b   : > { %p815_p13 = scmp.lt.s32.totalorder %s614_s15, 5  ;;  %p816_p0 = scmp.ge.s32.totalorder %s614_s15, 1 }
  0x2d   : > { %p155_p2 = pnand %p816_p0, %p815_p13 }
  0x2e   : > { %s744_s29 = sand.u32 (!%p155_p2), 1, %s606_s13  }
  0x2f   : > { %158 = sbr.rel (%p155_p2) target bundleno = 289 (0x121), region = 32  ;;  %s454_s30 = sshll.u32 (!%p155_p2), %s744_s29, 5 }
  0x30   : > { %s161_s5 = scalar_lea.sflag (!%p155_p2), [#allocation3], %s744_s29  ;;  %s164_s9 = scalar_lea.vmem (!%p155_p2), [#allocation2], %s454_s30 }
  0x36   : > { %593 = dma.done.wait (%p683_p6), %s161_s5, 512  }
  0x37   : > { %595 = vsyncadd (%p683_p6), %s161_s5, 4294966784  ;;  %v617_v0 = vmov 0.0   ;;  %v618_v1 = vmov 0   ;;  %v190_v2 = vld [vmem:[%s164_s9 + $0x8] sm:$0xff]  ;;  %v192_v3 = vld [vmem:[%s164_s9 + $0x18] sm:$0xff]  ;;  %vm194_vm0 = vcmask 64512  }
  0x38   : > { %262 = vmatprep.mubr.f32.mxu0 %v617_v0  ;;  %333 = vmatprep.mubr.f32.mxu1 %v617_v0  ;;  %v189_v4 = vld [vmem:[%s164_s9] sm:$0xff]  ;;  %v191_v5 = vld [vmem:[%s164_s9 + $0x10] sm:$0xff]  ;;  %s468_s8 = sshll.u32 %s661_s16, 9  ;;  %s186_s10 = scalar_lea.vmem [#allocation5], %s454_s30 }
  0x39   : > { %517 = vset.pattern.permute.xlu0 %v618_v1  ;;  %198 = vmatprep.subr.mxu0 %v190_v2  ;;  %v193_v6 = vld [vmem:[%s805_s0] sm:$0xff]  ;;  %s377_s11 = sshll.u32 %s186_s10, 4  ;;  %s762_s20 = scalar_lea.hbm %s808_s3, %s468_s8  ;;  %s764_s11 = int_to_ptr.vmem [resolvable:$true] %s377_s11 }
  0x3a   : > { %269 = vmatprep.subr.mxu1 %v192_v3  ;;  %v340_v7 = vld [vmem:[%s806_s1] sm:$0xff]  ;;  %199 = vmatpush1.msra.mxu0 %v189_v4  ;;  %s363_s16 = scalar_lea.sflag [#allocation4], %s744_s29  ;;  %s548_s22 = scalar_lea.vmem %s764_s11, 512 }
  0x3b   : > { %270 = vmatpush1.msra.mxu1 %v191_v5  ;;  %456 = vmatmul.mubr.msk.f32.vlgmr.msra.gmra.mrb[0].mxu0 %vm194_vm0, %v193_v6  ;;  %p549_p6 = scmp.ne.s32.totalorder %s764_s11, %s548_s22  ;;  %p817_p10 = scmp.ne.s32.totalorder %s812_s24, 0 }
  0x3c   : > { %457 = vmatmul.mubr.msk.f32.vlgmr.msra.gmra.mrb[0].mxu1 %vm194_vm0, %v193_v6  ;;  %343 = vperm.xlu0 %517, %v340_v7   ;;  %s619_s26 = smov [#allocation5]  }
  0x3d   : > { %p550_p11 = pnand %p549_p6, %p817_p10  ;;  %s552_s27 = sshll.u32 %s619_s26, 4  ;;  %s553_s27 = int_to_ptr.vmem [resolvable:$false] %s552_s27 }
  0x3e   : > { %s554_s28 = scalar_lea.vmem %s553_s27, 1024  ;;  %p555_p4 = scmp.lt.s32.totalorder %s764_s11, %s553_s27 }
  0x3f   : > { %p551_p12 = pneg %p550_p11  ;;  %p556_p9 = scmp.lt.s32.totalorder %s554_s28, %s548_s22 }
  0x41   : > { %p557_p1 = por %p556_p9, %p555_p4 }
  0x43   : > { %p558_p3 = pnand %p557_p1, %p551_p12 }
  0xbb   : > { %v344_v8 = vpop.permute.xlu0 %343 }
 0x10e   : > { %v264_v9 = vpop.f32.mrb[0].mxu0 }
 0x10f   : > { %v335_v10 = vpop.f32.mrb[0].mxu1  ;;  %vm346_vm1 = vcmp.ge.f32.partialorder %v264_v9, %v344_v8  ;;  %v266_v11 = vpop.f32.mrb[1].mxu0 }
 0x110   : > { %vm348_vm2 = vcmp.ge.f32.partialorder %v335_v10, %v344_v8  ;;  %v337_v12 = vpop.f32.mrb[1].mxu1  ;;  %v458_v13 = vsel %vm346_vm1, 1.0, %v617_v0  ;;  %vm347_vm3 = vcmp.ge.f32.partialorder %v266_v11, %v344_v8 }
 0x111   : > { %v460_v14 = vsel %vm348_vm2, 1.0, %v617_v0  ;;  %vm349_vm4 = vcmp.ge.f32.partialorder %v337_v12, %v344_v8  ;;  %358 = vst [vmem:[%s186_s10] sm:$0xff] %v458_v13  ;;  %v459_v15 = vsel %vm347_vm3, 1.0, %v617_v0 }
 0x112   : > { %360 = vst [vmem:[%s186_s10 + $0x10] sm:$0xff] %v460_v14  ;;  %v461_v16 = vsel %vm349_vm4, 1.0, %v617_v0  ;;  %359 = vst [vmem:[%s186_s10 + $0x8] sm:$0xff] %v459_v15 }
 0x113   : > { %361 = vst [vmem:[%s186_s10 + $0x18] sm:$0xff] %v461_v16 }
 0x114   : > { %561 = shalt.err (!%p558_p3)
}
 0x115   : > { %s562_s29 = scalar_lea.hbm %s762_s20, 512  ;;  %s566_s9 = scalar_lea.hbm %s808_s3, 2048 }
 0x116   : > { %p563_p5 = scmp.ne.s32.totalorder %s762_s20, %s562_s29  ;;  %p567_p13 = scmp.lt.u32.totalorder %s762_s20, %s808_s3 }
 0x117   : > { %p568_p0 = scmp.lt.u32.totalorder %s566_s9, %s562_s29  ;;  %p570_p6 = scmp.lt.u32.totalorder %s562_s29, %s762_s20 }
 0x118   : > { %p564_p7 = pnand %p563_p5, %p817_p10 }
 0x119   : > { %p569_p2 = por %p568_p0, %p567_p13 }
 0x11a   : > { %p565_p8 = pneg %p564_p7 }
 0x11b   : > { %p571_p11 = por %p570_p6, %p569_p2 }
 0x11d   : > { %p572_p12 = pnand %p571_p11, %p565_p8 }
 0x11f   : > { %575 = shalt.err (!%p572_p12)
}
 0x120   : > { %471 = dma.vmem_to_hbm [thread:$0]  (%p817_p10), %s764_s11, 512, %s762_s20, %s363_s16  }
 0x121 PF: > { %p482_p4 = scmp.ge.s32.totalorder %s614_s15, 2  ;;  %s389_s7 = sand.u32 1, %s602_s12  }
 0x122   : > { %p818_p9 = scmp.ne.s32.totalorder %s813_s25, 0  ;;  %s390_s23 = scalar_lea.sflag [#allocation4], %s389_s7 }
 0x124   : > { %p478_p1 = pnand %p482_p4, %p818_p9 }
 0x126   : > { %597 = dma.done.wait (!%p478_p1), %s390_s23, 512  }
 0x127   : > { %599 = vsyncadd (!%p478_p1), %s390_s23, 4294966784  ;;  %p16_p3 = scmp.ge.s32.totalorder %s665_s18, 6   ;;  %s819_s12 = smov %s606_s13 }
 0x128   : > { %s820_s13 = smov %s610_s14  ;;  %s821_s14 = smov %s677_s21 }
 0x129   : > { %s822_s15 = smov %s665_s18  ;;  %18 = sbr.rel (!%p16_p3) target bundleno = 5 (0x5), region = 77 }
 0x130   :  { %395 = vsyncpa [#allocation3], 1 }
 0x131   :  { %397 = vsyncpa [#allocation3 + $0x1], 1 }
 0x132   :  { %398 = vsyncpa [#allocation4], 1 }
 0x133   :  { %400 = vsyncpa [#allocation4 + $0x1], 1 }

</bundles_post_ra>
